<compile_context>
chip_gen: v7x
topology: tpu7x:2x2x1
jax: 0.10.0
libtpu: 0.0.40
codegen_flags: <defaults>
</compile_context>

<pallas_src>
import numpy as np
import jax
import jax.numpy as jnp
from jax.experimental import pallas as pl
from jax.experimental.pallas import tpu as pltpu


def _mlp_fused_kernel(x_ref, w_ref, b_ref, o_ref):
    # x_ref: [tile, D]   activations for this batch tile
    # w_ref: [out, D]    fused weight, lane-dense (row vector, out == 1)
    # b_ref: [1, out]    fused bias
    # o_ref: [tile, out]
    x = x_ref[...].astype(jnp.float32)
    w = w_ref[...].astype(jnp.float32)          # broadcast over rows (sublanes)
    # VPU elementwise multiply + XLU lane reduction; fp32 accumulate.
    y = jnp.sum(x * w, axis=-1, keepdims=True)
    o_ref[...] = (y + b_ref[...].astype(jnp.float32)).astype(o_ref.dtype)


def fuse_mlp_params(params):
    """Fold the eval-time affine chain once, host-side, in float64.

    params: list of (W[in, out], b[1, out]) per layer.
    Returns (w_row [out_dim, D_in] fp32 lane-dense, b_fused [1, out_dim] fp32).
    Call this ONCE at model load and reuse the result for every forward call.
    """
    w_f = np.asarray(params[0][0], dtype=np.float64)
    b_f = np.asarray(params[0][1], dtype=np.float64)
    for (w, b) in params[1:]:
        w64 = np.asarray(w, dtype=np.float64)
        b64 = np.asarray(b, dtype=np.float64)
        b_f = b_f @ w64 + b64
        w_f = w_f @ w64
    w_row = jnp.asarray(w_f.T, dtype=jnp.float32)    # [out_dim, D], lane-dense
    b_fused = jnp.asarray(b_f, dtype=jnp.float32)    # [1, out_dim]
    return w_row, b_fused


def mlp_forward(x, w_row, b_fused, *, batch_tile=512, core_parallel=False):
    """x: [B, input_size] (f32 or bf16 — cast to f32 inside the kernel).

    w_row/b_fused: output of fuse_mlp_params (computed once at model load).
    core_parallel: set True only when targeting v7x (2 TensorCores) with an
    even number of batch tiles; default keeps the safe serial-loop semantics.
    """
    B, D = x.shape
    out_dim, Dw = w_row.shape
    assert Dw == D, f"weight/input mismatch {Dw} vs {D}"

    if B > batch_tile:
        assert batch_tile % 8 == 0, "batch_tile must be a multiple of 8"
        tile = batch_tile
    else:
        # Small batch: one grid step (no split on single-TC v5e/v6e).
        tile = B
    n_tiles = pl.cdiv(B, tile)   # ragged last tile handled by Pallas (no pad)

    if core_parallel and n_tiles >= 2:
        sem = (pltpu.CORE_PARALLEL,)
    else:
        sem = ("parallel",)

    out = pl.pallas_call(
        _mlp_fused_kernel,
        out_shape=jax.ShapeDtypeStruct((B, out_dim), x.dtype),
        grid_spec=pltpu.PrefetchScalarGridSpec(
            num_scalar_prefetch=0,
            grid=(n_tiles,),
            in_specs=[
                pl.BlockSpec((tile, D), lambda i: (i, 0)),        # x tile
                pl.BlockSpec((out_dim, D), lambda i: (0, 0)),     # fused W (const)
                pl.BlockSpec((1, out_dim), lambda i: (0, 0)),     # fused b (const)
            ],
            out_specs=pl.BlockSpec((tile, out_dim), lambda i: (i, 0)),
        ),
        compiler_params=pltpu.CompilerParams(dimension_semantics=sem),
    )(x, w_row, b_fused)

    return out


def init_mlp_params(key, reward_type="other"):
    """Deterministic init matching the PyTorch module:
       weights ~ N(0, 1/(input_size+1)), biases = 0."""
    if reward_type in ("hpsv2", "PickScore"):
        input_size = 1024
    else:
        input_size = 768
    dims = [input_size, 1024, 128, 64, 16, 1]
    std = 1.0 / (input_size + 1)

    params = []
    for d_in, d_out in zip(dims[:-1], dims[1:]):
        key, wk = jax.random.split(key)
        # PyTorch Linear weight is [out, in]; store transposed [in, out]
        # so that y = x @ W + b == x @ W_pt.T + b.
        w = (jax.random.normal(wk, (d_out, d_in), dtype=jnp.float32) * std).T
        b = jnp.zeros((1, d_out), dtype=jnp.float32)
        params.append((jnp.asarray(w), b))
    return input_size, params


if __name__ == "__main__":
    key = jax.random.PRNGKey(0)
    reward_type = "other"  # -> input_size = 768

    input_size, params = init_mlp_params(key, reward_type)

    # Fuse ONCE at "model load" time; reused for every forward call.
    w_row, b_fused = fuse_mlp_params(params)

    batch = 64
    key, xk = jax.random.split(key)
    x = jax.random.normal(xk, (batch, input_size), dtype=jnp.float32)

    # Default path: small batch -> one grid step.
    out = jax.block_until_ready(mlp_forward(x, w_row, b_fused))

    # Also exercise the multi-tile path with a ragged last block (64 = 24+24+16).
    out_tiled = jax.block_until_ready(
        mlp_forward(x, w_row, b_fused, batch_tile=24))

    # Pure-JAX layered reference (dropout = identity at eval).
    ref = x
    for (w, b) in params:
        ref = ref @ w + b

    assert out.shape == (batch, 1), f"bad output shape {out.shape}"
    assert out_tiled.shape == (batch, 1), f"bad output shape {out_tiled.shape}"
    denom = float(jnp.max(jnp.abs(ref))) + 1e-30
    for name, o in (("single-tile", out), ("multi-tile", out_tiled)):
        rel_err = float(jnp.max(jnp.abs(o - ref))) / denom
        assert rel_err < 1e-3, f"{name} mismatch vs reference (rel_err={rel_err:.3e})"

    print("KERNEL_OK")
</pallas_src>

<mosaic_0001>
module attributes {stable_mosaic.version = 11 : i64} {
  func.func @_mlp_fused_kernel(%arg0: i32, %arg1: memref<64x768xf32, #tpu.memory_space<vmem>>, %arg2: memref<1x768xf32, #tpu.memory_space<vmem>>, %arg3: memref<1x1xf32, #tpu.memory_space<vmem>>, %arg4: memref<64x1xf32, #tpu.memory_space<vmem>>) attributes {dimension_semantics = [#tpu.dimension_semantics<parallel>], iteration_bounds = array<i64: 1>, scalar_prefetch = 0 : i64, scratch_operands = 0 : i64, tpu.core_type = #tpu.core_type<tc>, window_params = [{transform_indices = @transform_0, window_bounds = array<i64: 64, 768>}, {pipeline_mode = #tpu.pipeline_mode<synchronous>, transform_indices = @transform_1, window_bounds = array<i64: 1, 768>}, {pipeline_mode = #tpu.pipeline_mode<synchronous>, transform_indices = @transform_2, window_bounds = array<i64: 1, 1>}, {transform_indices = @transform_3, window_bounds = array<i64: 64, 1>}]} {
    %c0 = arith.constant 0 : index
    %c0_0 = arith.constant 0 : index
    %0 = vector.load %arg1[%c0, %c0_0] : memref<64x768xf32, #tpu.memory_space<vmem>>, vector<64x768xf32>
    %c0_1 = arith.constant 0 : index
    %c0_2 = arith.constant 0 : index
    %1 = vector.load %arg2[%c0_1, %c0_2] : memref<1x768xf32, #tpu.memory_space<vmem>>, vector<1x768xf32>
    %2 = vector.broadcast %1 : vector<1x768xf32> to vector<64x768xf32>
    %3 = arith.mulf %0, %2 : vector<64x768xf32>
    %cst = arith.constant dense<0.000000e+00> : vector<64xf32>
    %4 = vector.multi_reduction <add>, %3, %cst [1] : vector<64x768xf32> to vector<64xf32>
    %5 = vector.shape_cast %4 : vector<64xf32> to vector<64x1xf32>
    %c0_3 = arith.constant 0 : index
    %c0_4 = arith.constant 0 : index
    %6 = vector.load %arg3[%c0_3, %c0_4] : memref<1x1xf32, #tpu.memory_space<vmem>>, vector<1x1xf32>
    %7 = vector.broadcast %6 : vector<1x1xf32> to vector<64x1xf32>
    %8 = arith.addf %5, %7 : vector<64x1xf32>
    %c0_5 = arith.constant 0 : index
    %c0_6 = arith.constant 0 : index
    %9 = vector.load %arg4[%c0_5, %c0_6] : memref<64x1xf32, #tpu.memory_space<vmem>>, vector<64x1xf32>
    tpu.vector_store %arg4[%c0_5, %c0_6], %8 {strides = array<i32>} : memref<64x1xf32, #tpu.memory_space<vmem>>, vector<64x1xf32>,
    return
  }
  func.func @transform_0(%arg0: i32) -> (i32, i32) {
    %c0_i32 = arith.constant 0 : i32
    %c0_i32_0 = arith.constant 0 : i32
    return %arg0, %c0_i32 : i32, i32
  }
  func.func @transform_1(%arg0: i32) -> (i32, i32) {
    %c0_i32 = arith.constant 0 : i32
    %c0_i32_0 = arith.constant 0 : i32
    %c0_i32_1 = arith.constant 0 : i32
    return %c0_i32, %c0_i32_0 : i32, i32
  }
  func.func @transform_2(%arg0: i32) -> (i32, i32) {
    %c0_i32 = arith.constant 0 : i32
    %c0_i32_0 = arith.constant 0 : i32
    %c0_i32_1 = arith.constant 0 : i32
    return %c0_i32, %c0_i32_0 : i32, i32
  }
  func.func @transform_3(%arg0: i32) -> (i32, i32) {
    %c0_i32 = arith.constant 0 : i32
    %c0_i32_0 = arith.constant 0 : i32
    return %arg0, %c0_i32 : i32, i32
  }
}

</mosaic_0001>

<bundles_post_ra>
// kernel: tpu_custom_call.1
= control target key start
LH: loop header
LB: loop body
LE: loop exit
PB: predicated region body
PF: predicated region fallthrough
CT: control target
= control target key end

     0   :  { %s404_s0 = inlined_call_operand.hbm [shape: f32[64,768], index: 0, kind: input, shape index: {}]   ;;  %s405_s1 = inlined_call_operand.vmem [shape: f32[1,768], index: 1, kind: input, shape index: {}]   ;;  %s406_s2 = inlined_call_operand.<no memory space> [shape: f32[1,1], index: 2, kind: input, shape index: {}]   ;;  %s407_s3 = inlined_call_operand.vmem [shape: f32[64,1], index: 3, kind: output, shape index: {}]  }
   0x1   :  { %v8_v0 = vstv %s406_s2 }
   0x2   :  { %9 = vst [vmem:[#allocation2] sm:$0x1] %v8_v0 }
   0x3   :  { %10 = vsyncpa [#allocation4], 0  ;;  %s271_s14 = smov [#allocation3]   ;;  %s247_s18 = scalar_lea.hbm %s404_s0, 6144 }
   0x4   :  { %s16_s15 = sshll.u32 %s271_s14, 4  ;;  %p248_p0 = scmp.ne.s32.totalorder %s404_s0, %s247_s18  ;;  %s17_s15 = int_to_ptr.vmem [resolvable:$true] %s16_s15 }
   0x5   :  { %p251_p1 = scmp.lt.u32.totalorder %s247_s18, %s404_s0 }
   0x7   :  { %p253_p2 = pnand %p251_p1, %p248_p0 }
   0x9   :  { %256 = shalt.err (!%p253_p2)
}
   0xa   :  { %s257_s2 = scalar_lea.vmem %s17_s15, 6144  ;;  %p262_p4 = scmp.lt.s32.totalorder %s17_s15, %s17_s15 }
   0xb   :  { %p258_p3 = scmp.ne.s32.totalorder %s17_s15, %s257_s2  ;;  %p263_p5 = scmp.lt.s32.totalorder %s257_s2, %s257_s2 }
   0xd   :  { %p264_p6 = por %p263_p5, %p262_p4 }
   0xf   :  { %p265_p7 = pnand %p264_p6, %p258_p3 }
  0x11   :  { %268 = shalt.err (!%p265_p7)
}
  0x12   :  { %s272_s23 = smov 768   ;;  %s273_s24 = smov 48  }
  0x13   :  { %22 = dma.hbm_to_vmem [thread:$0]  %s404_s0, 6144, %s17_s15, [#allocation4], %s272_s23, %s272_s23, %s273_s24  }
  0x14   :  { %269 = dma.done.wait [#allocation4], 6144  }
  0x15   :  { %270 = vsyncadd [#allocation4], 4294961152  ;;  %v80_v1 = vlaneseq  ;;  %v42_v8 = vld [vmem:[#allocation3 + $0x60] sm:$0xff]  ;;  %v43_v10 = vld [vmem:[#allocation3 + $0x68] sm:$0xff]  ;;  %vm229_vm0 = vcmask 7168  }
  0x16   :  { %v44_v11 = vld [vmem:[#allocation3 + $0x70] sm:$0xff]  ;;  %v78_v12 = vld [vmem:[%s405_s1] sm:$0x3f]  ;;  %v31_v18 = vld [vmem:[#allocation3 + $0x8] sm:$0xff] }
  0x17   :  { %v81_v2 = vshrl.u32 %v80_v1, 7  ;;  %v30_v17 = vld [vmem:[#allocation3] sm:$0xff]  ;;  %v45_v19 = vld [vmem:[#allocation3 + $0x78] sm:$0xff]  ;;  %v32_v22 = vld [vmem:[#allocation3 + $0x10] sm:$0xff] }
  0x18   :  { %v46_v20 = vld [vmem:[#allocation3 + $0x80] sm:$0xff]  ;;  %v33_v27 = vld [vmem:[#allocation3 + $0x18] sm:$0xff]  ;;  %v48_v28 = vld [vmem:[#allocation3 + $0x90] sm:$0xff] }
  0x19   :  { %v82_v3 = vsub.s32 0, %v81_v2  ;;  %v86_v4 = vsub.s32 1, %v81_v2  ;;  %v90_v5 = vsub.s32 2, %v81_v2  ;;  %v94_v6 = vsub.s32 3, %v81_v2  ;;  %v49_v29 = vld [vmem:[#allocation3 + $0x98] sm:$0xff]  ;;  %v47_v30 = vld [vmem:[#allocation3 + $0x88] sm:$0xff] }
  0x1a   :  { %v98_v7 = vsub.s32 4, %v81_v2  ;;  %v102_v9 = vsub.s32 5, %v81_v2  ;;  %v34_v31 = vld [vmem:[#allocation3 + $0x20] sm:$0xff]  ;;  %v51_v39 = vld [vmem:[#allocation3 + $0xa8] sm:$0xff]  ;;  %v36_v40 = vld [vmem:[#allocation3 + $0x30] sm:$0xff] }
  0x1b   :  { %v312_v13 = vrot.slane %v78_v12, %v82_v3  ;;  %v314_v14 = vrot.slane %v78_v12, %v86_v4  ;;  %v316_v15 = vrot.slane %v78_v12, %v90_v5  ;;  %v318_v16 = vrot.slane %v78_v12, %v94_v6  ;;  %v50_v34 = vld [vmem:[#allocation3 + $0xa0] sm:$0xff]  ;;  %v35_v41 = vld [vmem:[#allocation3 + $0x28] sm:$0xff]  ;;  %v37_v46 = vld [vmem:[#allocation3 + $0x38] sm:$0xff] }
  0x1c   :  { %v320_v21 = vrot.slane %v78_v12, %v98_v7  ;;  %v322_v23 = vrot.slane %v78_v12, %v102_v9  ;;  %v38_v47 = vld [vmem:[#allocation3 + $0x40] sm:$0xff]  ;;  %v52_v51 = vld [vmem:[#allocation3 + $0xb0] sm:$0xff]  ;;  %v39_v53 = vld [vmem:[#allocation3 + $0x48] sm:$0xff] }
  0x1d   :  { %v122_v24 = vmul.f32 %v312_v13, %v42_v8  ;;  %v123_v25 = vmul.f32 %v314_v14, %v43_v10  ;;  %v124_v26 = vmul.f32 %v316_v15, %v44_v11  ;;  %v110_v32 = vmul.f32 %v312_v13, %v30_v17  ;;  %v60_v58 = vld [vmem:[#allocation3 + $0xf0] sm:$0xff]  ;;  %v61_v59 = vld [vmem:[#allocation3 + $0xf8] sm:$0xff]  ;;  %v62_v1 = vld [vmem:[#allocation3 + $0x100] sm:$0xff] }
  0x1e   :  { %v111_v33 = vmul.f32 %v314_v14, %v31_v18  ;;  %v125_v35 = vmul.f32 %v318_v16, %v45_v19  ;;  %v126_v36 = vmul.f32 %v320_v21, %v46_v20  ;;  %v112_v38 = vmul.f32 %v316_v15, %v32_v22  ;;  %v53_v62 = vld [vmem:[#allocation3 + $0xb8] sm:$0xff]  ;;  %v40_v5 = vld [vmem:[#allocation3 + $0x50] sm:$0xff]  ;;  %v63_v7 = vld [vmem:[#allocation3 + $0x108] sm:$0xff] }
  0x1f   :  { %v172_v37 = vadd.f32 %v123_v25, %v122_v24  ;;  %v113_v42 = vmul.f32 %v318_v16, %v33_v27  ;;  %v128_v44 = vmul.f32 %v312_v13, %v48_v28  ;;  %v129_v45 = vmul.f32 %v314_v14, %v49_v29  ;;  %v54_v12 = vld [vmem:[#allocation3 + $0xc0] sm:$0xff]  ;;  %v41_v20 = vld [vmem:[#allocation3 + $0x58] sm:$0xff]  ;;  %v55_v24 = vld [vmem:[#allocation3 + $0xc8] sm:$0xff] }
  0x20   :  { %v158_v43 = vadd.f32 %v111_v33, %v110_v32  ;;  %v127_v48 = vmul.f32 %v322_v23, %v47_v30  ;;  %v114_v50 = vmul.f32 %v320_v21, %v34_v31  ;;  %v130_v52 = vmul.f32 %v316_v15, %v50_v34  ;;  %v56_v25 = vld [vmem:[#allocation3 + $0xd0] sm:$0xff]  ;;  %v57_v31 = vld [vmem:[#allocation3 + $0xd8] sm:$0xff] }
  0x21   :  { %v173_v49 = vadd.f32 %v172_v37, %v124_v26  ;;  %v131_v55 = vmul.f32 %v318_v16, %v51_v39  ;;  %v179_v56 = vadd.f32 %v129_v45, %v128_v44  ;;  %v116_v57 = vmul.f32 %v312_v13, %v36_v40  ;;  %v64_v29 = vld [vmem:[#allocation3 + $0x110] sm:$0xff]  ;;  %v73_v37 = vld [vmem:[#allocation3 + $0x158] sm:$0xff]  ;;  %v74_v44 = vld [vmem:[#allocation3 + $0x160] sm:$0xff] }
  0x22   :  { %v159_v54 = vadd.f32 %v158_v43, %v112_v38  ;;  %v115_v61 = vmul.f32 %v322_v23, %v35_v41  ;;  %v117_v63 = vmul.f32 %v314_v14, %v37_v46  ;;  %v118_v0 = vmul.f32 %v316_v15, %v38_v47  ;;  %v65_v40 = vld [vmem:[#allocation3 + $0x118] sm:$0xff]  ;;  %v58_v41 = vld [vmem:[#allocation3 + $0xe0] sm:$0xff] }
  0x23   :  { %v174_v60 = vadd.f32 %v173_v49, %v125_v35  ;;  %v132_v3 = vmul.f32 %v320_v21, %v52_v51  ;;  %v180_v4 = vadd.f32 %v179_v56, %v130_v52  ;;  %v119_v6 = vmul.f32 %v318_v16, %v39_v53  ;;  %v75_v49 = vld [vmem:[#allocation3 + $0x168] sm:$0xff]  ;;  %v68_v56 = vld [vmem:[#allocation3 + $0x130] sm:$0xff] }
  0x24   :  { %v160_v2 = vadd.f32 %v159_v54, %v113_v42  ;;  %v165_v9 = vadd.f32 %v117_v63, %v116_v57  ;;  %v140_v10 = vmul.f32 %v312_v13, %v60_v58  ;;  %v141_v11 = vmul.f32 %v314_v14, %v61_v59  ;;  %v66_v54 = vld [vmem:[#allocation3 + $0x120] sm:$0xff]  ;;  %v59_v59 = vld [vmem:[#allocation3 + $0xe8] sm:$0xff] }
  0x25   :  { %v175_v8 = vadd.f32 %v174_v60, %v126_v36  ;;  %v133_v18 = vmul.f32 %v322_v23, %v53_v62  ;;  %v181_v19 = vadd.f32 %v180_v4, %v131_v55  ;;  %v142_v22 = vmul.f32 %v316_v15, %v62_v1  ;;  %v72_v36 = vld [vmem:[#allocation3 + $0x150] sm:$0xff]  ;;  %v67_v55 = vld [vmem:[#allocation3 + $0x128] sm:$0xff] }
  0x26   :  { %v161_v17 = vadd.f32 %v160_v2, %v114_v50  ;;  %v120_v27 = vmul.f32 %v320_v21, %v40_v5  ;;  %v166_v28 = vadd.f32 %v165_v9, %v118_v0  ;;  %v143_v30 = vmul.f32 %v318_v16, %v63_v7  ;;  %v77_v5 = vld [vmem:[#allocation3 + $0x178] sm:$0xff] }
  0x27   :  { %v176_v26 = vadd.f32 %v175_v8, %v127_v48  ;;  %v182_v33 = vadd.f32 %v181_v19, %v132_v3  ;;  %v193_v34 = vadd.f32 %v141_v11, %v140_v10  ;;  %v134_v35 = vmul.f32 %v312_v13, %v54_v12  ;;  %v69_v3 = vld [vmem:[#allocation3 + $0x138] sm:$0xff] }
  0x28   :  { %v162_v32 = vadd.f32 %v161_v17, %v115_v61  ;;  %v121_v38 = vmul.f32 %v322_v23, %v41_v20  ;;  %v167_v39 = vadd.f32 %v166_v28, %v119_v6  ;;  %v135_v42 = vmul.f32 %v314_v14, %v55_v24  ;;  %v76_v61 = vld [vmem:[#allocation3 + $0x170] sm:$0xff]  ;;  %v70_v17 = vld [vmem:[#allocation3 + $0x140] sm:$0xff] }
  0x29   :  { %177 = vadd.xlane.f32.xlu1 %v176_v26  ;;  %v136_v43 = vmul.f32 %v316_v15, %v56_v25  ;;  %v183_v45 = vadd.f32 %v182_v33, %v133_v18  ;;  %v144_v46 = vmul.f32 %v320_v21, %v64_v29  ;;  %v194_v47 = vadd.f32 %v193_v34, %v142_v22  ;;  %v71_v25 = vld [vmem:[#allocation3 + $0x148] sm:$0xff] }
  0x2a   :  { %163 = vadd.xlane.f32.xlu0 %v162_v32  ;;  %v137_v48 = vmul.f32 %v318_v16, %v57_v31  ;;  %v168_v50 = vadd.f32 %v167_v39, %v120_v27  ;;  %v186_v51 = vadd.f32 %v135_v42, %v134_v35  ;;  %v152_v52 = vmul.f32 %v312_v13, %v72_v36  ;;  %v243_v32 = vld [vmem:[#allocation2] ss:$0 sm:$0xff] }
  0x2b   :  { %v153_v53 = vmul.f32 %v314_v14, %v73_v37  ;;  %v145_v57 = vmul.f32 %v322_v23, %v65_v40  ;;  %v195_v58 = vadd.f32 %v194_v47, %v143_v30  ;;  %v138_v60 = vmul.f32 %v320_v21, %v58_v41 }
  0x2c   :  { %v154_v62 = vmul.f32 %v316_v15, %v74_v44  ;;  %v169_v63 = vadd.f32 %v168_v50, %v121_v38  ;;  %v187_v0 = vadd.f32 %v186_v51, %v136_v43  ;;  %v155_v1 = vmul.f32 %v318_v16, %v75_v49 }
  0x2d   :  { %184 = vadd.xlane.f32.xlu1 %v183_v45  ;;  %v207_v2 = vadd.f32 %v153_v53, %v152_v52  ;;  %v196_v4 = vadd.f32 %v195_v58, %v144_v46  ;;  %v146_v6 = vmul.f32 %v312_v13, %v66_v54  ;;  %v147_v7 = vmul.f32 %v314_v14, %v67_v55 }
  0x2e   :  { %v148_v8 = vmul.f32 %v316_v15, %v68_v56  ;;  %170 = vadd.xlane.f32.xlu0 %v169_v63  ;;  %v139_v9 = vmul.f32 %v322_v23, %v59_v59  ;;  %v188_v10 = vadd.f32 %v187_v0, %v137_v48  ;;  %v156_v11 = vmul.f32 %v320_v21, %v76_v61 }
  0x2f   :  { %v208_v12 = vadd.f32 %v207_v2, %v154_v62  ;;  %v197_v18 = vadd.f32 %v196_v4, %v145_v57  ;;  %v149_v19 = vmul.f32 %v318_v16, %v69_v3  ;;  %v200_v20 = vadd.f32 %v147_v7, %v146_v6 }
  0x30   :  { %v189_v22 = vadd.f32 %v188_v10, %v138_v60  ;;  %v157_v24 = vmul.f32 %v322_v23, %v77_v5  ;;  %v150_v14 = vmul.f32 %v320_v21, %v70_v17  ;;  %v151_v28 = vmul.f32 %v322_v23, %v71_v25 }
  0x31   :  { %v209_v13 = vadd.f32 %v208_v12, %v155_v1  ;;  %198 = vadd.xlane.f32.xlu1 %v197_v18  ;;  %v201_v15 = vadd.f32 %v200_v20, %v148_v8 }
  0x32   :  { %v190_v26 = vadd.f32 %v189_v22, %v139_v9 }
  0x33   :  { %v210_v27 = vadd.f32 %v209_v13, %v156_v11  ;;  %v202_v29 = vadd.f32 %v201_v15, %v149_v19 }
  0x34   :  { %191 = vadd.xlane.f32.xlu0 %v190_v26 }
  0x35   :  { %v211_v30 = vadd.f32 %v210_v27, %v157_v24  ;;  %v203_v31 = vadd.f32 %v202_v29, %v150_v14 }
  0x37   :  { %212 = vadd.xlane.f32.xlu1 %v211_v30  ;;  %v204_v16 = vadd.f32 %v203_v31, %v151_v28 }
  0x39   :  { %205 = vadd.xlane.f32.xlu0 %v204_v16 }
  0xb6   :  { %v178_v33 = vpop.xlane.xlu1 %177 }
  0xb7   :  { %v223_v34 = vadd.f32 %v243_v32, %v178_v33  ;;  %v164_v35 = vpop.xlane.xlu0 %163 }
  0xb8   :  { %v221_v36 = vadd.f32 %v243_v32, %v164_v35 }
  0xb9   :  { %232 = vst.msk [vmem:[%s407_s3 + $0x10] sm:$0xff] %vm229_vm0, %v223_v34 }
  0xba   :  { %230 = vst.msk [vmem:[%s407_s3] sm:$0xff] %vm229_vm0, %v221_v36  ;;  %v185_v21 = vpop.xlane.xlu1 %184 }
  0xbb   :  { %v224_v23 = vadd.f32 %v243_v32, %v185_v21  ;;  %v171_v37 = vpop.xlane.xlu0 %170 }
  0xbc   :  { %v222_v38 = vadd.f32 %v243_v32, %v171_v37 }
  0xbd   :  { %233 = vst.msk [vmem:[%s407_s3 + $0x18] sm:$0xff] %vm229_vm0, %v224_v23 }
  0xbe   :  { %231 = vst.msk [vmem:[%s407_s3 + $0x8] sm:$0xff] %vm229_vm0, %v222_v38  ;;  %v199_v39 = vpop.xlane.xlu1 %198 }
  0xbf   :  { %v226_v40 = vadd.f32 %v243_v32, %v199_v39 }
  0xc1   :  { %235 = vst.msk [vmem:[%s407_s3 + $0x28] sm:$0xff] %vm229_vm0, %v226_v40  ;;  %v192_v41 = vpop.xlane.xlu0 %191 }
  0xc2   :  { %v225_v42 = vadd.f32 %v243_v32, %v192_v41 }
  0xc4   :  { %v213_v43 = vpop.xlane.xlu1 %212  ;;  %234 = vst.msk [vmem:[%s407_s3 + $0x20] sm:$0xff] %vm229_vm0, %v225_v42 }
  0xc5   :  { %v228_v44 = vadd.f32 %v243_v32, %v213_v43 }
  0xc6   :  { %v206_v45 = vpop.xlane.xlu0 %205 }
  0xc7   :  { %237 = vst.msk [vmem:[%s407_s3 + $0x38] sm:$0xff] %vm229_vm0, %v228_v44  ;;  %v227_v46 = vadd.f32 %v243_v32, %v206_v45 }
  0xc9   :  { %236 = vst.msk [vmem:[%s407_s3 + $0x30] sm:$0xff] %vm229_vm0, %v227_v46 }
  0xca   :  { %242 = vsyncpa [#allocation4], 1 }

</bundles_post_ra>
